<compile_context>
chip_gen: v5e
topology: v5e:2x2
jax: 0.10.0
libtpu: 0.0.40
codegen_flags: <defaults>
</compile_context>

<pallas_src>
import functools

import jax
import jax.numpy as jnp
import numpy as np
from jax.experimental import pallas as pl
from jax.experimental.pallas import tpu as pltpu

EPS = 1e-5
N_HEADS = 6
LANE = 128


def _round_up(x, m):
    return (x + m - 1) // m * m


def make_clser_kernel(n_valid):
    """n_valid = B*Ho*Wo, the true number of BN positions (padded rows are zero)."""
    inv_n = 1.0 / float(n_valid)

    def kernel(patches_ref, wc_ref, pool_ref, w1_ref, w2_ref, vecs_ref, out_ref):
        # --- Conv2d(C, C, 3, s=2, p=1) + bias: ONE im2col MXU matmul.
        #     patches: (Np, K) with a ones column; wc: (K, Cp) with a bias row. ---
        conv = jnp.dot(patches_ref[...], wc_ref[...],
                       preferred_element_type=jnp.float32)               # (Np, Cp)

        # --- BatchNorm2d (training-mode batch stats, biased var), single pass.
        #     Padded rows/lanes are exactly zero so they contribute nothing;
        #     single-pass E[x^2]-E[x]^2 is fine at these scales. ---
        mean = jnp.sum(conv, axis=0, keepdims=True) * inv_n               # (1, Cp)
        var = jnp.sum(conv * conv, axis=0, keepdims=True) * inv_n - mean * mean
        gamma = vecs_ref[0:1, :]
        beta = vecs_ref[1:2, :]
        scale = gamma * jax.lax.rsqrt(var + EPS)                          # (1, Cp)
        shift = beta - mean * scale
        y = jnp.maximum(conv * scale + shift, 0.0)                        # (Np, Cp)

        # --- AdaptiveAvgPool2d(1).squeeze() as a pooling-matrix matmul. ---
        feat = jnp.dot(pool_ref[...], y,
                       preferred_element_type=jnp.float32)                # (Bp, Cp)

        # --- 6 heads fused: Linear(C,C)+ReLU via concatenated w1,
        #     Linear(C,2) via block-diagonal w2; biases from the packed rows. ---
        h = jnp.maximum(
            jnp.dot(feat, w1_ref[...], preferred_element_type=jnp.float32)
            + vecs_ref[2:3, :], 0.0)                                      # (Bp, HD)
        out_ref[...] = (jnp.dot(h, w2_ref[...],
                                preferred_element_type=jnp.float32)
                        + vecs_ref[3:4, :])                               # (Bp, OD)

    return kernel


def pack_params(params, *, C, B, H):
    """One-time packing of all weights into lane-dense, kernel-ready tensors."""
    assert 9 * C + 1 <= LANE and N_HEADS * C <= LANE and C <= LANE
    K = _round_up(9 * C + 1, LANE)          # im2col contraction dim (+ bias col)
    Cp = _round_up(C, LANE)                 # conv output channels, lane-dense
    HD = _round_up(N_HEADS * C, LANE)       # fused head hidden width
    OD = _round_up(2 * N_HEADS, LANE)       # fused head output width

    Ho = (H - 1) // 2 + 1
    Wo = Ho
    N = B * Ho * Wo
    Np = _round_up(max(N, 8), 8)
    Bp = _round_up(max(B, 8), 8)

    # im2col conv weight: rows ordered (kh*3+kw)*C + ci, extra row = conv bias.
    w_tap = jnp.transpose(params['w_conv'], (2, 3, 1, 0)).reshape(9 * C, C)
    wc = jnp.concatenate([w_tap, params['b_conv'][None, :]], axis=0)      # (9C+1, C)
    wc = jnp.pad(wc, ((0, K - (9 * C + 1)), (0, Cp - C)))

    # Pooling matrix: row b averages that batch's Ho*Wo rows of the activation.
    pool = np.zeros((Bp, Np), np.float32)
    sp = Ho * Wo
    for b in range(B):
        pool[b, b * sp:(b + 1) * sp] = 1.0 / sp
    pool = jnp.asarray(pool)

    # Head layer-1 weights concatenated along output axis; layer-2 block-diag.
    w1c = jnp.transpose(params['w1'], (1, 0, 2)).reshape(C, N_HEADS * C)
    w1c = jnp.pad(w1c, ((0, Cp - C), (0, HD - N_HEADS * C)))
    w2bd = jnp.zeros((N_HEADS * C, 2 * N_HEADS), jnp.float32)
    for i in range(N_HEADS):
        w2bd = w2bd.at[i * C:(i + 1) * C, 2 * i:2 * i + 2].set(params['w2'][i])
    w2bd = jnp.pad(w2bd, ((0, HD - N_HEADS * C), (0, OD - 2 * N_HEADS)))

    # gamma / beta / b1 / b2 packed into a single (8, 128) tensor (one DMA).
    # Padded gamma/beta lanes are ZERO so padded channels stay exactly zero.
    vecs = jnp.zeros((8, LANE), jnp.float32)
    vecs = vecs.at[0, :C].set(params['gamma'])
    vecs = vecs.at[1, :C].set(params['beta'])
    vecs = vecs.at[2, :N_HEADS * C].set(params['b1'].reshape(-1))
    vecs = vecs.at[3, :2 * N_HEADS].set(params['b2'].reshape(-1))

    return {'wc': wc, 'pool': pool, 'w1c': w1c, 'w2bd': w2bd, 'vecs': vecs}


def lidc_clser_forward(x_nchw, packed):
    """x_nchw: (B, C, H, H) float32. Returns a list of 6 arrays of shape (B, 2)."""
    B, C, H, W = x_nchw.shape
    Ho = (H - 1) // 2 + 1
    Wo = (W - 1) // 2 + 1
    N = B * Ho * Wo
    K = packed['wc'].shape[0]
    Bp, Np = packed['pool'].shape
    OD = packed['w2bd'].shape[1]

    # ---- per-call glue (XLA): NCHW -> NHWC, pad=1, im2col patches (+ones col) ----
    xp = jnp.pad(jnp.transpose(x_nchw, (0, 2, 3, 1)),
                 ((0, 0), (1, 1), (1, 1), (0, 0)))
    taps = [xp[:, kh::2, kw::2, :][:, :Ho, :Wo, :]
            for kh in range(3) for kw in range(3)]
    patches = jnp.stack(taps, axis=3).reshape(N, 9 * C)   # tap-major, channel-minor
    patches = jnp.concatenate(
        [patches, jnp.ones((N, 1), patches.dtype)], axis=1)          # bias column
    patches = jnp.pad(patches, ((0, Np - N), (0, K - (9 * C + 1))))  # (Np, K)

    vmem = pl.BlockSpec(memory_space=pltpu.MemorySpace.VMEM)
    out = pl.pallas_call(
        make_clser_kernel(N),
        out_shape=jax.ShapeDtypeStruct((Bp, OD), jnp.float32),
        in_specs=[vmem] * 6,
        out_specs=vmem,
    )(patches, packed['wc'], packed['pool'], packed['w1c'],
      packed['w2bd'], packed['vecs'])

    # Lane-dense (Bp, 128) kernel output -> 6 x (B, 2) predictions.
    return [out[:B, 2 * i:2 * i + 2] for i in range(N_HEADS)]


def init_params(key, C):
    ks = jax.random.split(key, 8)
    p = {}
    p['w_conv'] = 0.1 * jax.random.normal(ks[0], (C, C, 3, 3), jnp.float32)  # OIHW
    p['b_conv'] = 0.1 * jax.random.normal(ks[1], (C,), jnp.float32)
    p['gamma'] = 1.0 + 0.1 * jax.random.normal(ks[2], (C,), jnp.float32)
    p['beta'] = 0.1 * jax.random.normal(ks[3], (C,), jnp.float32)
    # Linear weights stored directly as (in, out) matrices.
    p['w1'] = 0.1 * jax.random.normal(ks[4], (N_HEADS, C, C), jnp.float32)
    p['b1'] = 0.1 * jax.random.normal(ks[5], (N_HEADS, C), jnp.float32)
    p['w2'] = 0.1 * jax.random.normal(ks[6], (N_HEADS, C, 2), jnp.float32)
    p['b2'] = 0.1 * jax.random.normal(ks[7], (N_HEADS, 2), jnp.float32)
    return p


def reference_forward(x_nchw, params):
    """Pure-JAX reference mirroring the PyTorch forward (training-mode BN)."""
    conv = jax.lax.conv_general_dilated(
        x_nchw, params['w_conv'], window_strides=(2, 2),
        padding=((1, 1), (1, 1)),
        dimension_numbers=('NCHW', 'OIHW', 'NCHW'))
    conv = conv + params['b_conv'][None, :, None, None]
    mean = conv.mean(axis=(0, 2, 3), keepdims=True)
    var = conv.var(axis=(0, 2, 3), keepdims=True)   # biased, as in PyTorch BN fwd
    y = params['gamma'][None, :, None, None] * (conv - mean) / jnp.sqrt(var + EPS)
    y = jnp.maximum(y + params['beta'][None, :, None, None], 0.0)
    feat = y.mean(axis=(2, 3))                      # (B, C)  == pool(x).squeeze()
    preds = []
    for i in range(N_HEADS):
        h = jnp.maximum(feat @ params['w1'][i] + params['b1'][i], 0.0)
        preds.append(h @ params['w2'][i] + params['b2'][i])
    return preds


if __name__ == "__main__":
    key = jax.random.PRNGKey(0)
    kx, kp = jax.random.split(key)

    B, C, H = 2, 8, 16                       # in_dim = 8, x: (B, C, H, H)
    x = jax.random.normal(kx, (B, C, H, H), dtype=jnp.float32)
    params = init_params(kp, C)

    # One-time parameter packing, hoisted out of the per-call forward.
    packed = pack_params(params, C=C, B=B, H=H)

    fwd = jax.jit(lidc_clser_forward)
    preds = fwd(x, packed)
    preds = [jax.block_until_ready(p) for p in preds]

    ref = reference_forward(x, params)
    assert len(preds) == N_HEADS
    for a, b in zip(preds, ref):
        assert a.shape == (B, 2)
        np.testing.assert_allclose(np.asarray(a), np.asarray(b), rtol=1e-4, atol=1e-4)

    print("KERNEL_OK")
</pallas_src>

<mosaic_0001>
module attributes {stable_mosaic.version = 11 : i64} {
  func.func @kernel(%arg0: memref<128x128xf32, #tpu.memory_space<vmem>>, %arg1: memref<128x128xf32, #tpu.memory_space<vmem>>, %arg2: memref<8x128xf32, #tpu.memory_space<vmem>>, %arg3: memref<128x128xf32, #tpu.memory_space<vmem>>, %arg4: memref<128x128xf32, #tpu.memory_space<vmem>>, %arg5: memref<8x128xf32, #tpu.memory_space<vmem>>, %arg6: memref<8x128xf32, #tpu.memory_space<vmem>>) attributes {dimension_semantics = [], scalar_prefetch = 0 : i64, scratch_operands = 0 : i64, tpu.core_type = #tpu.core_type<tc>} {
    %c0 = arith.constant 0 : index
    %c0_0 = arith.constant 0 : index
    %0 = vector.load %arg0[%c0, %c0_0] : memref<128x128xf32, #tpu.memory_space<vmem>>, vector<128x128xf32>
    %c0_1 = arith.constant 0 : index
    %c0_2 = arith.constant 0 : index
    %1 = vector.load %arg1[%c0_1, %c0_2] : memref<128x128xf32, #tpu.memory_space<vmem>>, vector<128x128xf32>
    %cst = arith.constant dense<0.000000e+00> : vector<128x128xf32>
    %2 = tpu.matmul %0, %1, %cst {dimension_numbers = #tpu.dot_dimension_numbers<[1], [0], [0], [1], [0, 0, 1, 1], [], []>} : vector<128x128xf32>, vector<128x128xf32>, vector<128x128xf32> -> vector<128x128xf32>
    %cst_3 = arith.constant dense<0.000000e+00> : vector<128xf32>
    %3 = vector.multi_reduction <add>, %2, %cst_3 [0] : vector<128x128xf32> to vector<128xf32>
    %4 = vector.shape_cast %3 : vector<128xf32> to vector<1x128xf32>
    %cst_4 = arith.constant 7.812500e-03 : f32
    %5 = vector.broadcast %cst_4 : f32 to vector<1x128xf32>
    %6 = arith.mulf %4, %5 : vector<1x128xf32>
    %7 = arith.mulf %2, %2 : vector<128x128xf32>
    %cst_5 = arith.constant dense<0.000000e+00> : vector<128xf32>
    %8 = vector.multi_reduction <add>, %7, %cst_5 [0] : vector<128x128xf32> to vector<128xf32>
    %9 = vector.shape_cast %8 : vector<128xf32> to vector<1x128xf32>
    %cst_6 = arith.constant 7.812500e-03 : f32
    %10 = vector.broadcast %cst_6 : f32 to vector<1x128xf32>
    %11 = arith.mulf %9, %10 : vector<1x128xf32>
    %12 = arith.mulf %6, %6 : vector<1x128xf32>
    %13 = arith.subf %11, %12 : vector<1x128xf32>
    %c0_7 = arith.constant 0 : index
    %c0_8 = arith.constant 0 : index
    %14 = vector.load %arg5[%c0_7, %c0_8] : memref<8x128xf32, #tpu.memory_space<vmem>>, vector<1x128xf32>
    %c1 = arith.constant 1 : index
    %c0_9 = arith.constant 0 : index
    %15 = vector.load %arg5[%c1, %c0_9] : memref<8x128xf32, #tpu.memory_space<vmem>>, vector<1x128xf32>
    %cst_10 = arith.constant 9.99999974E-6 : f32
    %16 = vector.broadcast %cst_10 : f32 to vector<1x128xf32>
    %17 = arith.addf %13, %16 : vector<1x128xf32>
    %18 = math.rsqrt %17 : vector<1x128xf32>
    %19 = arith.mulf %14, %18 : vector<1x128xf32>
    %20 = arith.mulf %6, %19 : vector<1x128xf32>
    %21 = arith.subf %15, %20 : vector<1x128xf32>
    %22 = vector.broadcast %19 : vector<1x128xf32> to vector<128x128xf32>
    %23 = arith.mulf %2, %22 : vector<128x128xf32>
    %24 = vector.broadcast %21 : vector<1x128xf32> to vector<128x128xf32>
    %25 = arith.addf %23, %24 : vector<128x128xf32>
    %cst_11 = arith.constant 0.000000e+00 : f32
    %26 = vector.broadcast %cst_11 : f32 to vector<128x128xf32>
    %27 = arith.maximumf %25, %26 : vector<128x128xf32>
    %c0_12 = arith.constant 0 : index
    %c0_13 = arith.constant 0 : index
    %28 = vector.load %arg2[%c0_12, %c0_13] : memref<8x128xf32, #tpu.memory_space<vmem>>, vector<8x128xf32>
    %cst_14 = arith.constant dense<0.000000e+00> : vector<8x128xf32>
    %29 = tpu.matmul %28, %27, %cst_14 {dimension_numbers = #tpu.dot_dimension_numbers<[1], [0], [0], [1], [0, 0, 1, 1], [], []>} : vector<8x128xf32>, vector<128x128xf32>, vector<8x128xf32> -> vector<8x128xf32>
    %c0_15 = arith.constant 0 : index
    %c0_16 = arith.constant 0 : index
    %30 = vector.load %arg3[%c0_15, %c0_16] : memref<128x128xf32, #tpu.memory_space<vmem>>, vector<128x128xf32>
    %cst_17 = arith.constant dense<0.000000e+00> : vector<8x128xf32>
    %31 = tpu.matmul %29, %30, %cst_17 {dimension_numbers = #tpu.dot_dimension_numbers<[1], [0], [0], [1], [0, 0, 1, 1], [], []>} : vector<8x128xf32>, vector<128x128xf32>, vector<8x128xf32> -> vector<8x128xf32>
    %c2 = arith.constant 2 : index
    %c0_18 = arith.constant 0 : index
    %32 = vector.load %arg5[%c2, %c0_18] : memref<8x128xf32, #tpu.memory_space<vmem>>, vector<1x128xf32>
    %33 = vector.broadcast %32 : vector<1x128xf32> to vector<8x128xf32>
    %34 = arith.addf %31, %33 : vector<8x128xf32>
    %cst_19 = arith.constant 0.000000e+00 : f32
    %35 = vector.broadcast %cst_19 : f32 to vector<8x128xf32>
    %36 = arith.maximumf %34, %35 : vector<8x128xf32>
    %c0_20 = arith.constant 0 : index
    %c0_21 = arith.constant 0 : index
    %37 = vector.load %arg4[%c0_20, %c0_21] : memref<128x128xf32, #tpu.memory_space<vmem>>, vector<128x128xf32>
    %cst_22 = arith.constant dense<0.000000e+00> : vector<8x128xf32>
    %38 = tpu.matmul %36, %37, %cst_22 {dimension_numbers = #tpu.dot_dimension_numbers<[1], [0], [0], [1], [0, 0, 1, 1], [], []>} : vector<8x128xf32>, vector<128x128xf32>, vector<8x128xf32> -> vector<8x128xf32>
    %c3 = arith.constant 3 : index
    %c0_23 = arith.constant 0 : index
    %39 = vector.load %arg5[%c3, %c0_23] : memref<8x128xf32, #tpu.memory_space<vmem>>, vector<1x128xf32>
    %40 = vector.broadcast %39 : vector<1x128xf32> to vector<8x128xf32>
    %41 = arith.addf %38, %40 : vector<8x128xf32>
    %c0_24 = arith.constant 0 : index
    %c0_25 = arith.constant 0 : index
    %42 = vector.load %arg6[%c0_24, %c0_25] : memref<8x128xf32, #tpu.memory_space<vmem>>, vector<8x128xf32>
    tpu.vector_store %arg6[%c0_24, %c0_25], %41 {strides = array<i32>} : memref<8x128xf32, #tpu.memory_space<vmem>>, vector<8x128xf32>,
    return
  }
}

</mosaic_0001>

<bundles_post_ra>
// kernel: lidc_clser_forward.1
= control target key start
LH: loop header
LB: loop body
LE: loop exit
PB: predicated region body
PF: predicated region fallthrough
CT: control target
= control target key end

     0   :  { %s774_s1 = inlined_call_operand.vmem [shape: f32[128,128], index: 1, kind: input, shape index: {}]   ;;  %s775_s0 = inlined_call_operand.vmem [shape: f32[128,128], index: 0, kind: input, shape index: {}]   ;;  %s776_s5 = inlined_call_operand.vmem [shape: f32[8,128], index: 5, kind: input, shape index: {}]   ;;  %s777_s3 = inlined_call_operand.vmem [shape: f32[128,128], index: 3, kind: input, shape index: {}]   ;;  %s778_s2 = inlined_call_operand.vmem [shape: f32[8,128], index: 2, kind: input, shape index: {}]   ;;  %s779_s4 = inlined_call_operand.vmem [shape: f32[128,128], index: 4, kind: input, shape index: {}]   ;;  %s780_s6 = inlined_call_operand.vmem [shape: f32[8,128], index: 6, kind: output, shape index: {}]  }
   0x1   :  { %v54_v0 = vld [vmem:[%s774_s1 + $0x78] sm:$0xff]  ;;  %v53_v1 = vld [vmem:[%s774_s1 + $0x70] sm:$0xff]  ;;  %v52_v2 = vld [vmem:[%s774_s1 + $0x68] sm:$0xff] }
   0x2   :  { %55 = vmatpush.msra.mxu0 %v54_v0  ;;  %351 = vmatpush.msra.mxu1 %v54_v0  ;;  %v51_v3 = vld [vmem:[%s774_s1 + $0x60] sm:$0xff]  ;;  %v50_v4 = vld [vmem:[%s774_s1 + $0x58] sm:$0xff]  ;;  %v49_v5 = vld [vmem:[%s774_s1 + $0x50] sm:$0xff] }
   0x3   :  { %352 = vmatpush.msra.mxu2 %v54_v0  ;;  %353 = vmatpush.msra.mxu3 %v54_v0  ;;  %v48_v6 = vld [vmem:[%s774_s1 + $0x48] sm:$0xff]  ;;  %v47_v7 = vld [vmem:[%s774_s1 + $0x40] sm:$0xff]  ;;  %v46_v8 = vld [vmem:[%s774_s1 + $0x38] sm:$0xff] }
   0x4   :  { %56 = vmatpush.msra.mxu0 %v53_v1  ;;  %354 = vmatpush.msra.mxu1 %v53_v1  ;;  %v45_v9 = vld [vmem:[%s774_s1 + $0x30] sm:$0xff]  ;;  %v44_v10 = vld [vmem:[%s774_s1 + $0x28] sm:$0xff]  ;;  %v43_v11 = vld [vmem:[%s774_s1 + $0x20] sm:$0xff] }
   0x5   :  { %355 = vmatpush.msra.mxu2 %v53_v1  ;;  %356 = vmatpush.msra.mxu3 %v53_v1  ;;  %v42_v12 = vld [vmem:[%s774_s1 + $0x18] sm:$0xff]  ;;  %v41_v13 = vld [vmem:[%s774_s1 + $0x10] sm:$0xff]  ;;  %v40_v14 = vld [vmem:[%s774_s1 + $0x8] sm:$0xff] }
   0x6   :  { %57 = vmatpush.msra.mxu0 %v52_v2  ;;  %357 = vmatpush.msra.mxu1 %v52_v2  ;;  %v39_v15 = vld [vmem:[%s774_s1] sm:$0xff]  ;;  %v28_v17 = vld [vmem:[%s775_s0 + $0x28] sm:$0xff]  ;;  %v29_v21 = vld [vmem:[%s775_s0 + $0x30] sm:$0xff] }
   0x7   :  { %358 = vmatpush.msra.mxu2 %v52_v2  ;;  %359 = vmatpush.msra.mxu3 %v52_v2  ;;  %v23_v16 = vld [vmem:[%s775_s0] sm:$0xff]  ;;  %v32_v18 = vld [vmem:[%s775_s0 + $0x48] sm:$0xff]  ;;  %v33_v22 = vld [vmem:[%s775_s0 + $0x50] sm:$0xff] }
   0x8   :  { %58 = vmatpush.msra.mxu0 %v51_v3  ;;  %360 = vmatpush.msra.mxu1 %v51_v3  ;;  %v36_v19 = vld [vmem:[%s775_s0 + $0x68] sm:$0xff]  ;;  %v37_v23 = vld [vmem:[%s775_s0 + $0x70] sm:$0xff]  ;;  %v30_v25 = vld [vmem:[%s775_s0 + $0x38] sm:$0xff] }
   0x9   :  { %361 = vmatpush.msra.mxu2 %v51_v3  ;;  %362 = vmatpush.msra.mxu3 %v51_v3  ;;  %v24_v20 = vld [vmem:[%s775_s0 + $0x8] sm:$0xff]  ;;  %v25_v24 = vld [vmem:[%s775_s0 + $0x10] sm:$0xff]  ;;  %v34_v26 = vld [vmem:[%s775_s0 + $0x58] sm:$0xff] }
   0xa   :  { %59 = vmatpush.msra.mxu0 %v50_v4  ;;  %363 = vmatpush.msra.mxu1 %v50_v4  ;;  %v38_v27 = vld [vmem:[%s775_s0 + $0x78] sm:$0xff]  ;;  %v31_v29 = vld [vmem:[%s775_s0 + $0x40] sm:$0xff] }
   0xb   :  { %364 = vmatpush.msra.mxu2 %v50_v4  ;;  %365 = vmatpush.msra.mxu3 %v50_v4  ;;  %v26_v28 = vld [vmem:[%s775_s0 + $0x18] sm:$0xff]  ;;  %v35_v30 = vld [vmem:[%s775_s0 + $0x60] sm:$0xff] }
   0xc   :  { %60 = vmatpush.msra.mxu0 %v49_v5  ;;  %366 = vmatpush.msra.mxu1 %v49_v5  ;;  %v27_v31 = vld [vmem:[%s775_s0 + $0x20] sm:$0xff] }
   0xd   :  { %367 = vmatpush.msra.mxu2 %v49_v5  ;;  %368 = vmatpush.msra.mxu3 %v49_v5 }
   0xe   :  { %61 = vmatpush.msra.mxu0 %v48_v6  ;;  %369 = vmatpush.msra.mxu1 %v48_v6 }
   0xf   :  { %370 = vmatpush.msra.mxu2 %v48_v6  ;;  %371 = vmatpush.msra.mxu3 %v48_v6 }
  0x10   :  { %62 = vmatpush.msra.mxu0 %v47_v7  ;;  %372 = vmatpush.msra.mxu1 %v47_v7 }
  0x11   :  { %373 = vmatpush.msra.mxu2 %v47_v7  ;;  %374 = vmatpush.msra.mxu3 %v47_v7 }
  0x12   :  { %63 = vmatpush.msra.mxu0 %v46_v8  ;;  %375 = vmatpush.msra.mxu1 %v46_v8 }
  0x13   :  { %376 = vmatpush.msra.mxu2 %v46_v8  ;;  %377 = vmatpush.msra.mxu3 %v46_v8 }
  0x14   :  { %64 = vmatpush.msra.mxu0 %v45_v9  ;;  %378 = vmatpush.msra.mxu1 %v45_v9 }
  0x15   :  { %379 = vmatpush.msra.mxu2 %v45_v9  ;;  %380 = vmatpush.msra.mxu3 %v45_v9 }
  0x16   :  { %65 = vmatpush.msra.mxu0 %v44_v10  ;;  %381 = vmatpush.msra.mxu1 %v44_v10 }
  0x17   :  { %382 = vmatpush.msra.mxu2 %v44_v10  ;;  %383 = vmatpush.msra.mxu3 %v44_v10 }
  0x18   :  { %66 = vmatpush.msra.mxu0 %v43_v11  ;;  %384 = vmatpush.msra.mxu1 %v43_v11 }
  0x19   :  { %385 = vmatpush.msra.mxu2 %v43_v11  ;;  %386 = vmatpush.msra.mxu3 %v43_v11 }
  0x1a   :  { %67 = vmatpush.msra.mxu0 %v42_v12  ;;  %387 = vmatpush.msra.mxu1 %v42_v12 }
  0x1b   :  { %388 = vmatpush.msra.mxu2 %v42_v12  ;;  %389 = vmatpush.msra.mxu3 %v42_v12 }
  0x1c   :  { %68 = vmatpush.msra.mxu0 %v41_v13  ;;  %390 = vmatpush.msra.mxu1 %v41_v13 }
  0x1d   :  { %391 = vmatpush.msra.mxu2 %v41_v13  ;;  %392 = vmatpush.msra.mxu3 %v41_v13 }
  0x1e   :  { %69 = vmatpush.msra.mxu0 %v40_v14  ;;  %393 = vmatpush.msra.mxu1 %v40_v14 }
  0x1f   :  { %394 = vmatpush.msra.mxu2 %v40_v14  ;;  %395 = vmatpush.msra.mxu3 %v40_v14 }
  0x20   :  { %70 = vmatpush.msra.mxu0 %v39_v15  ;;  %396 = vmatpush.msra.mxu1 %v39_v15 }
  0x21   :  { %71 = vmatmul.f32.vlgmr.msra.gmra.mxu0 %v23_v16  ;;  %86 = vmatmul.f32.vlgmr.msra.gmra.mxu1 %v28_v17 }
  0x22   :  { %397 = vmatpush.msra.mxu2 %v39_v15  ;;  %398 = vmatpush.msra.mxu3 %v39_v15 }
  0x23   :  { %98 = vmatmul.f32.vlgmr.msra.gmra.mxu2 %v32_v18  ;;  %110 = vmatmul.f32.vlgmr.msra.gmra.mxu3 %v36_v19 }
  0x29   :  { %74 = vmatmul.f32.gmra.mxu0 %v24_v20  ;;  %89 = vmatmul.f32.gmra.mxu1 %v29_v21 }
  0x2b   :  { %101 = vmatmul.f32.gmra.mxu2 %v33_v22  ;;  %113 = vmatmul.f32.gmra.mxu3 %v37_v23 }
  0x31   :  { %77 = vmatmul.f32.gmra.mxu0 %v25_v24  ;;  %92 = vmatmul.f32.gmra.mxu1 %v30_v25 }
  0x33   :  { %104 = vmatmul.f32.gmra.mxu2 %v34_v26  ;;  %116 = vmatmul.f32.gmra.mxu3 %v38_v27 }
  0x39   :  { %80 = vmatmul.f32.gmra.mxu0 %v26_v28  ;;  %95 = vmatmul.f32.gmra.mxu1 %v31_v29 }
  0x3b   :  { %107 = vmatmul.f32.gmra.mxu2 %v35_v30 }
  0x41   :  { %83 = vmatmul.f32.gmra.mxu0 %v27_v31 }
  0x9e   :  { %v534_v32 = vpop.f32.mrf.mxu0  ;;  %v536_v33 = vpop.f32.mrf.mxu1 }
  0x9f   :  { %v142_v42 = vmul.f32 %v534_v32, %v534_v32  ;;  %v147_v56 = vmul.f32 %v536_v33, %v536_v33 }
  0xa6   :  { %v538_v34 = vpop.f32.mrf.mxu0  ;;  %v540_v35 = vpop.f32.mrf.mxu2 }
  0xa7   :  { %v544_v37 = vpop.f32.mrf.mxu1  ;;  %v143_v40 = vmul.f32 %v538_v34, %v538_v34  ;;  %v120_v43 = vadd.f32 %v538_v34, %v534_v32  ;;  %v563_v48 = vpop.f32.mrf.mxu3  ;;  %v151_v6 = vmul.f32 %v540_v35, %v540_v35 }
  0xa8   :  { %v148_v60 = vmul.f32 %v544_v37, %v544_v37  ;;  %v155_v20 = vmul.f32 %v563_v48, %v563_v48 }
  0xa9   :  { %v158_v45 = vadd.f32 %v143_v40, %v142_v42 }
  0xae   :  { %v542_v36 = vpop.f32.mrf.mxu0  ;;  %v548_v39 = vpop.f32.mrf.mxu2 }
  0xaf   :  { %v552_v41 = vpop.f32.mrf.mxu1  ;;  %v144_v44 = vmul.f32 %v542_v36, %v542_v36  ;;  %v121_v46 = vadd.f32 %v120_v43, %v542_v36  ;;  %v586_v3 = vpop.f32.mrf.mxu3  ;;  %v152_v10 = vmul.f32 %v548_v39, %v548_v39 }
  0xb0   :  { %v149_v0 = vmul.f32 %v552_v41, %v552_v41  ;;  %v156_v23 = vmul.f32 %v586_v3, %v586_v3 }
  0xb1   :  { %v159_v49 = vadd.f32 %v158_v45, %v144_v44 }
  0xb6   :  { %v546_v38 = vpop.f32.mrf.mxu0  ;;  %v571_v55 = vpop.f32.mrf.mxu2 }
  0xb7   :  { %v145_v47 = vmul.f32 %v546_v38, %v546_v38  ;;  %v122_v50 = vadd.f32 %v121_v46, %v546_v38  ;;  %v576_v59 = vpop.f32.mrf.mxu1  ;;  %v153_v14 = vmul.f32 %v571_v55, %v571_v55  ;;  %v117_v19 = vpop.f32.mrf.mxu3 }
  0xb8   :  { %v150_v2 = vmul.f32 %v576_v59, %v576_v59  ;;  %v157_v26 = vmul.f32 %v117_v19, %v117_v19 }
  0xb9   :  { %v160_v52 = vadd.f32 %v159_v49, %v145_v47 }
  0xbe   :  { %v566_v51 = vpop.f32.mrf.mxu0  ;;  %v592_v9 = vpop.f32.mrf.mxu2 }
  0xbf   :  { %v123_v53 = vadd.f32 %v122_v50, %v566_v51  ;;  %v146_v54 = vmul.f32 %v566_v51, %v566_v51  ;;  %v154_v16 = vmul.f32 %v592_v9, %v592_v9 }
  0xc1   :  { %v124_v57 = vadd.f32 %v123_v53, %v536_v33  ;;  %v161_v58 = vadd.f32 %v160_v52, %v146_v54 }
  0xc3   :  { %v162_v61 = vadd.f32 %v161_v58, %v147_v56  ;;  %v125_v62 = vadd.f32 %v124_v57, %v544_v37 }
  0xc5   :  { %v126_v63 = vadd.f32 %v125_v62, %v552_v41  ;;  %v163_v1 = vadd.f32 %v162_v61, %v148_v60 }
  0xc7   :  { %v164_v4 = vadd.f32 %v163_v1, %v149_v0  ;;  %v127_v5 = vadd.f32 %v126_v63, %v576_v59  ;;  %v182_v1 = vld [vmem:[%s776_s5] sm:$0x1] }
  0xc9   :  { %v128_v7 = vadd.f32 %v127_v5, %v540_v35  ;;  %v165_v8 = vadd.f32 %v164_v4, %v150_v2 }
  0xcb   :  { %v166_v11 = vadd.f32 %v165_v8, %v151_v6  ;;  %v129_v12 = vadd.f32 %v128_v7, %v548_v39  ;;  %v183_v6 = vld [vmem:[%s776_s5 + $0x1] sm:$0x1] }
  0xcd   :  { %v130_v13 = vadd.f32 %v129_v12, %v571_v55  ;;  %v167_v15 = vadd.f32 %v166_v11, %v152_v10 }
  0xcf   :  { %v168_v17 = vadd.f32 %v167_v15, %v153_v14  ;;  %v131_v18 = vadd.f32 %v130_v13, %v592_v9 }
  0xd1   :  { %v132_v21 = vadd.f32 %v131_v18, %v563_v48  ;;  %v169_v22 = vadd.f32 %v168_v17, %v154_v16 }
  0xd3   :  { %v170_v24 = vadd.f32 %v169_v22, %v155_v20  ;;  %v133_v25 = vadd.f32 %v132_v21, %v586_v3 }
  0xd5   :  { %v134_v27 = vadd.f32 %v133_v25, %v117_v19  ;;  %v171_v28 = vadd.f32 %v170_v24, %v156_v23  ;;  %v282_v25 = vld [vmem:[%s777_s3 + $0x68] sm:$0xff] }
  0xd7   :  { %v135_v29 = vrot.slane %v134_v27, 4  ;;  %v172_v30 = vadd.f32 %v171_v28, %v157_v26  ;;  %v281_v28 = vld [vmem:[%s777_s3 + $0x60] sm:$0xff] }
  0xd9   :  { %v136_v31 = vadd.f32 %v135_v29, %v134_v27  ;;  %v173_v40 = vrot.slane %v172_v30, 4 }
  0xdb   :  { %v137_v42 = vrot.slane %v136_v31, 2  ;;  %v174_v43 = vadd.f32 %v173_v40, %v172_v30 }
  0xdd   :  { %v138_v44 = vadd.f32 %v137_v42, %v136_v31  ;;  %v175_v45 = vrot.slane %v174_v43, 2  ;;  %v280_v31 = vld [vmem:[%s777_s3 + $0x58] sm:$0xff] }
  0xdf   :  { %v139_v46 = vrot.slane %v138_v44, 1  ;;  %v176_v47 = vadd.f32 %v175_v45, %v174_v43  ;;  %v279_v43 = vld [vmem:[%s777_s3 + $0x50] sm:$0xff] }
  0xe1   :  { %v140_v49 = vadd.f32 %v139_v46, %v138_v44  ;;  %v177_v50 = vrot.slane %v176_v47, 1  ;;  %v278_v46 = vld [vmem:[%s777_s3 + $0x48] sm:$0xff] }
  0xe3   :  { %v141_v52 = vmul.f32 0.0078125, %v140_v49  ;;  %v178_v53 = vadd.f32 %v177_v50, %v176_v47  ;;  %v277_v50 = vld [vmem:[%s777_s3 + $0x40] sm:$0xff] }
  0xe5   :  { %v179_v54 = vmul.f32 0.0078125, %v178_v53  ;;  %v180_v56 = vmul.f32 %v141_v52, %v141_v52 }
  0xe7   :  { %v181_v57 = vsub.f32 %v179_v54, %v180_v56  ;;  %v276_v54 = vld [vmem:[%s777_s3 + $0x38] sm:$0xff] }
  0xe9   :  { %v184_v58 = vadd.f32 1e-05, %v181_v57 }
  0xeb   :  { %401 = vrsqrt.f32 %v184_v58  ;;  %vm191_vm1 = vweird.f32 %v184_v58 }
  0xf1   :  { %v402_v60 = vpop.eup %401 }
  0xf2   :  { %v186_v61 = vmul.f32 %v402_v60, %v184_v58  ;;  %vm192_vm0 = vweird.f32 %v402_v60  ;;  %v275_v58 = vld [vmem:[%s777_s3 + $0x30] sm:$0xff] }
  0xf3   :  { %vm193_vm2 = vmor %vm191_vm1, %vm192_vm0 }
  0xf4   :  { %v187_v62 = vmul.f32 %v402_v60, %v186_v61 }
  0xf6   :  { %v188_v63 = vmul.f32 0.5, %v187_v62  ;;  %v274_v62 = vld [vmem:[%s777_s3 + $0x28] sm:$0xff] }
  0xf8   :  { %v189_v0 = vsub.f32 1.5, %v188_v63 }
  0xfa   :  { %v190_v2 = vmul.f32 %v402_v60, %v189_v0 }
  0xfc   :  { %v194_v4 = vsel %vm193_vm2, %v402_v60, %v190_v2 }
  0xfd   :  { %v195_v5 = vmul.f32 %v194_v4, %v182_v1  ;;  %v273_v1 = vld [vmem:[%s777_s3 + $0x20] sm:$0xff] }
  0xff   :  { %v196_v7 = vmul.f32 %v195_v5, %v141_v52  ;;  %v615_v8 = vperm.slane %v195_v5, 0  ;;  %v272_v5 = vld [vmem:[%s777_s3 + $0x18] sm:$0xff] }
 0x101   :  { %v197_v10 = vsub.f32 %v183_v6, %v196_v7  ;;  %v214_v11 = vmul.f32 %v615_v8, %v117_v19  ;;  %v213_v13 = vmul.f32 %v615_v8, %v586_v3  ;;  %v212_v16 = vmul.f32 %v615_v8, %v563_v48  ;;  %v284_v19 = vld [vmem:[%s777_s3 + $0x78] sm:$0xff]  ;;  %v283_v48 = vld [vmem:[%s777_s3 + $0x70] sm:$0xff] }
 0x102   :  { %v211_v20 = vmul.f32 %v615_v8, %v592_v9  ;;  %v210_v22 = vmul.f32 %v615_v8, %v571_v55  ;;  %287 = vmatpush.msrb.mxu2 %v284_v19  ;;  %v209_v24 = vmul.f32 %v615_v8, %v548_v39  ;;  %v208_v27 = vmul.f32 %v615_v8, %v540_v35  ;;  %v271_v7 = vld [vmem:[%s777_s3 + $0x10] sm:$0xff]  ;;  %v316_v19 = vld [vmem:[%s779_s4 + $0x40] sm:$0xff] }
 0x103   :  { %v618_v12 = vperm.slane %v197_v10, 0  ;;  %v207_v30 = vmul.f32 %v615_v8, %v576_v59  ;;  %v206_v42 = vmul.f32 %v615_v8, %v552_v41  ;;  %v205_v45 = vmul.f32 %v615_v8, %v544_v37 }
 0x104   :  { %288 = vmatpush.msrb.mxu2 %v283_v48  ;;  %v204_v49 = vmul.f32 %v615_v8, %v536_v33  ;;  %v203_v53 = vmul.f32 %v615_v8, %v566_v51  ;;  %v202_v57 = vmul.f32 %v615_v8, %v546_v38  ;;  %v201_v61 = vmul.f32 %v615_v8, %v542_v36  ;;  %v312_v48 = vld [vmem:[%s779_s4 + $0x20] sm:$0xff] }
 0x105   :  { %v231_v14 = vadd.f32 %v618_v12, %v214_v11  ;;  %v230_v15 = vadd.f32 %v618_v12, %v213_v13  ;;  %v229_v18 = vadd.f32 %v618_v12, %v212_v16  ;;  %v228_v3 = vadd.f32 %v618_v12, %v211_v20  ;;  %v248_v11 = vld [vmem:[%s778_s2] sm:$0xff]  ;;  %v323_v13 = vld [vmem:[%s779_s4 + $0x78] sm:$0xff]  ;;  %v317_v20 = vld [vmem:[%s779_s4 + $0x48] sm:$0xff] }
 0x106   :  { %v227_v9 = vadd.f32 %v618_v12, %v210_v22  ;;  %v226_v55 = vadd.f32 %v618_v12, %v209_v24  ;;  %289 = vmatpush.msrb.mxu2 %v282_v25  ;;  %v225_v39 = vadd.f32 %v618_v12, %v208_v27  ;;  %v224_v35 = vadd.f32 %v618_v12, %v207_v30  ;;  %v320_v16 = vld [vmem:[%s779_s4 + $0x60] sm:$0xff]  ;;  %v313_v22 = vld [vmem:[%s779_s4 + $0x28] sm:$0xff]  ;;  %v310_v24 = vld [vmem:[%s779_s4 + $0x10] sm:$0xff] }
 0x107   :  { %v247_v17 = vmax.f32 %v231_v14, 0.0  ;;  %v246_v21 = vmax.f32 %v230_v15, 0.0  ;;  %v245_v23 = vmax.f32 %v229_v18, 0.0  ;;  %v244_v26 = vmax.f32 %v228_v3, 0.0  ;;  %v322_v14 = vld [vmem:[%s779_s4 + $0x70] sm:$0xff]  ;;  %326 = vmatpush.msrb.mxu3 %v323_v13  ;;  %v321_v15 = vld [vmem:[%s779_s4 + $0x68] sm:$0xff] }
 0x108   :  { %v243_v29 = vmax.f32 %v227_v9, 0.0  ;;  %290 = vmatpush.msrb.mxu2 %v281_v28  ;;  %v242_v40 = vmax.f32 %v226_v55, 0.0  ;;  %v241_v44 = vmax.f32 %v225_v39, 0.0  ;;  %v223_v59 = vadd.f32 %v618_v12, %v206_v42  ;;  %v318_v18 = vld [vmem:[%s779_s4 + $0x50] sm:$0xff]  ;;  %v309_v25 = vld [vmem:[%s779_s4 + $0x8] sm:$0xff] }
 0x109   :  { %249 = vmatpush.msrb.mxu1 %v247_v17  ;;  %v240_v47 = vmax.f32 %v224_v35, 0.0  ;;  %v222_v41 = vadd.f32 %v618_v12, %v205_v45  ;;  %v221_v37 = vadd.f32 %v618_v12, %v204_v49  ;;  %v220_v33 = vadd.f32 %v618_v12, %v203_v53  ;;  %327 = vmatpush.msrb.mxu3 %v322_v14  ;;  %v319_v17 = vld [vmem:[%s779_s4 + $0x58] sm:$0xff]  ;;  %v314_v3 = vld [vmem:[%s779_s4 + $0x30] sm:$0xff]  ;;  %v399_v55 = vld [vmem:[%s776_s5 + $0x2] ss:$0 sm:$0xff] }
 0x10a   :  { %291 = vmatpush.msrb.mxu2 %v280_v31  ;;  %v239_v52 = vmax.f32 %v223_v59, 0.0  ;;  %v219_v51 = vadd.f32 %v618_v12, %v202_v57  ;;  %v218_v38 = vadd.f32 %v618_v12, %v201_v61  ;;  %v200_v0 = vmul.f32 %v615_v8, %v538_v34  ;;  %v400_v39 = vld [vmem:[%s776_s5 + $0x3] ss:$0 sm:$0xff] }
 0x10b   :  { %250 = vmatpush.msrb.mxu1 %v246_v21  ;;  %v238_v56 = vmax.f32 %v222_v41, 0.0  ;;  %v237_v60 = vmax.f32 %v221_v37, 0.0  ;;  %v236_v63 = vmax.f32 %v220_v33, 0.0  ;;  %v199_v4 = vmul.f32 %v615_v8, %v534_v32  ;;  %v270_v32 = vld [vmem:[%s777_s3 + $0x8] sm:$0xff]  ;;  %328 = vmatpush.msrb.mxu3 %v321_v15  ;;  %v315_v21 = vld [vmem:[%s779_s4 + $0x38] sm:$0xff] }
 0x10c   :  { %292 = vmatpush.msrb.mxu2 %v279_v43  ;;  %v235_v2 = vmax.f32 %v219_v51, 0.0  ;;  %v217_v36 = vadd.f32 %v618_v12, %v200_v0  ;;  %v234_v6 = vmax.f32 %v218_v38, 0.0 }
 0x10d   :  { %251 = vmatpush.msrb.mxu1 %v245_v23  ;;  %v216_v34 = vadd.f32 %v618_v12, %v199_v4  ;;  %v269_v12 = vld [vmem:[%s777_s3] sm:$0xff]  ;;  %329 = vmatpush.msrb.mxu3 %v320_v16  ;;  %v311_v23 = vld [vmem:[%s779_s4 + $0x18] sm:$0xff] }
 0x10e   :  { %293 = vmatpush.msrb.mxu2 %v278_v46  ;;  %v233_v10 = vmax.f32 %v217_v36, 0.0 }
 0x10f   :  { %252 = vmatpush.msrb.mxu1 %v244_v26  ;;  %v232_v8 = vmax.f32 %v216_v34, 0.0  ;;  %330 = vmatpush.msrb.mxu3 %v319_v17  ;;  %v308_v26 = vld [vmem:[%s779_s4] sm:$0xff] }
 0x110   :  { %294 = vmatpush.msrb.mxu2 %v277_v50 }
 0x111   :  { %253 = vmatpush.msrb.mxu1 %v243_v29  ;;  %331 = vmatpush.msrb.mxu3 %v318_v18 }
 0x112   :  { %295 = vmatpush.msrb.mxu2 %v276_v54 }
 0x113   :  { %254 = vmatpush.msrb.mxu1 %v242_v40  ;;  %332 = vmatpush.msrb.mxu3 %v317_v20 }
 0x114   :  { %296 = vmatpush.msrb.mxu2 %v275_v58 }
 0x115   :  { %255 = vmatpush.msrb.mxu1 %v241_v44  ;;  %333 = vmatpush.msrb.mxu3 %v316_v19 }
 0x116   :  { %297 = vmatpush.msrb.mxu2 %v274_v62 }
 0x117   :  { %256 = vmatpush.msrb.mxu1 %v240_v47  ;;  %334 = vmatpush.msrb.mxu3 %v315_v21 }
 0x118   :  { %298 = vmatpush.msrb.mxu2 %v273_v1 }
 0x119   :  { %257 = vmatpush.msrb.mxu1 %v239_v52  ;;  %335 = vmatpush.msrb.mxu3 %v314_v3 }
 0x11a   :  { %299 = vmatpush.msrb.mxu2 %v272_v5 }
 0x11b   :  { %258 = vmatpush.msrb.mxu1 %v238_v56  ;;  %336 = vmatpush.msrb.mxu3 %v313_v22 }
 0x11c   :  { %300 = vmatpush.msrb.mxu2 %v271_v7 }
 0x11d   :  { %259 = vmatpush.msrb.mxu1 %v237_v60  ;;  %337 = vmatpush.msrb.mxu3 %v312_v48 }
 0x11e   :  { %301 = vmatpush.msrb.mxu2 %v270_v32 }
 0x11f   :  { %260 = vmatpush.msrb.mxu1 %v236_v63  ;;  %338 = vmatpush.msrb.mxu3 %v311_v23 }
 0x120   :  { %302 = vmatpush.msrb.mxu2 %v269_v12 }
 0x121   :  { %261 = vmatpush.msrb.mxu1 %v235_v2  ;;  %339 = vmatpush.msrb.mxu3 %v310_v24 }
 0x123   :  { %262 = vmatpush.msrb.mxu1 %v234_v6  ;;  %340 = vmatpush.msrb.mxu3 %v309_v25 }
 0x125   :  { %263 = vmatpush.msrb.mxu1 %v233_v10  ;;  %341 = vmatpush.msrb.mxu3 %v308_v26 }
 0x127   :  { %264 = vmatpush.msrb.mxu1 %v232_v8 }
 0x128   :  { %265 = vmatmul.f32.vlgmr.msrb.gmra.mxu1 %v248_v11 }
 0x1a5   :  { %v266_v9 = vpop.f32.mrf.mxu1 }
 0x1a6   :  { %303 = vmatmul.f32.vlgmr.msrb.gmra.mxu2 %v266_v9 }
 0x229   :  { %v304_v27 = vpop.f32.mrf.mxu2 }
 0x22a   :  { %v305_v28 = vadd.f32 %v399_v55, %v304_v27 }
 0x22c   :  { %v307_v29 = vmax.f32 %v305_v28, 0.0 }
 0x22e   :  { %342 = vmatmul.f32.vlgmr.msrb.gmra.mxu3 %v307_v29 }
 0x2b1   :  { %v343_v30 = vpop.f32.mrf.mxu3 }
 0x2b2   :  { %v344_v31 = vadd.f32 %v400_v39, %v343_v30 }
 0x2b4   :  { %346 = vst [vmem:[%s780_s6] sm:$0xff] %v344_v31 }

</bundles_post_ra>
